<compile_context>
chip_gen: v5e
topology: v5e:2x2
jax: 0.10.0
libtpu: 0.0.40
codegen_flags: <defaults>
</compile_context>

<pallas_src>
import functools
import math

import jax
import jax.numpy as jnp
from jax.experimental import pallas as pl
from jax.experimental.pallas import tpu as pltpu


# --------------------------- Pallas kernel ---------------------------------

def _vae_kernel(
    # batch-tiled input (VMEM): [TB, in_pad] f32 = [x (w,a,z,y) | eps | unif | zero-pad]
    xin_ref,
    # packed weights / biases (VMEM, resident across the grid)
    w1_ref, b1_ref,          # fc1
    w2122_ref, b2122_ref,    # [fc21 | fc22]
    wdec_ref, bdec_ref,      # [fc_z | fc_w | fc_a(u) | fc_y1(u)]
    waz_ref,                 # fc_a(z_) part
    wy1a_ref, wy1w_ref,      # fc_y1 a- / w- parts (separate -> no in-kernel concat)
    wy2_ref, by2_ref,        # fc_y2
    # output (VMEM): [TB, out_pad] f32 = [w_ | a_ | z_ | y_ | mu | logvar | zero-pad]
    out_ref,
    *, C, dim_u, dim_z, dim_w, dim_a, dim_y, in_features, out_pad,
):
    f32 = jnp.float32
    bf16 = jnp.bfloat16

    xin = xin_ref[...]
    x = xin[:, :in_features].astype(bf16)
    eps = xin[:, in_features:in_features + dim_u]
    unif = xin[:, in_features + dim_u:in_features + dim_u + dim_a]

    # ---- encode: h1 = relu(fc1(cat[w,a,z,y])) ; [mu|logvar] = h1 @ [W21|W22] + [b21|b22]
    h1 = jnp.dot(x, w1_ref[...], preferred_element_type=f32) + b1_ref[...]
    h1 = jnp.maximum(h1, 0.0)

    mulv = jnp.dot(h1.astype(bf16), w2122_ref[...],
                   preferred_element_type=f32) + b2122_ref[...]
    mu = mulv[:, :dim_u]
    logvar = mulv[:, dim_u:]

    # ---- reparameterize: u = mu + eps * exp(C * logvar)   (C baked as a static constant)
    std = jnp.exp(C * logvar)
    u = mu + eps * std

    # ---- fused decode: one u @ [Wz | Ww | Wa_u | Wy1_u] matmul, then static lane slices
    dec = jnp.dot(u.astype(bf16), wdec_ref[...],
                  preferred_element_type=f32) + bdec_ref[...]
    z_ = dec[:, :dim_z]
    w_ = dec[:, dim_z:dim_z + dim_w]
    a_logit_u = dec[:, dim_z + dim_w:dim_z + dim_w + dim_a]
    hy_u = dec[:, dim_z + dim_w + dim_a:]

    # decode_a: bernoulli(sigmoid(fc_a(cat[u, z_])))
    a_logits = a_logit_u + jnp.dot(z_.astype(bf16), waz_ref[...],
                                   preferred_element_type=f32)
    a_prob = pl.reciprocal(1.0 + jnp.exp(-a_logits), approx=True)  # EUP exp + EUP recip
    a_ = (unif < a_prob).astype(f32)

    # decode_y: fc_y2(relu(fc_y1(cat[u, a_, w_]))) ; a-/w- parts as two extra matmuls
    h_y = (hy_u
           + jnp.dot(a_.astype(bf16), wy1a_ref[...], preferred_element_type=f32)
           + jnp.dot(w_.astype(bf16), wy1w_ref[...], preferred_element_type=f32))
    h_y = jnp.maximum(h_y, 0.0)
    y_ = jnp.dot(h_y.astype(bf16), wy2_ref[...],
                 preferred_element_type=f32) + by2_ref[...]

    # ---- one lane-dense (128-lane padded) output slab, single full-lane store
    tb = xin.shape[0]
    used = dim_w + dim_a + dim_z + dim_y + 2 * dim_u
    pad = jnp.zeros((tb, out_pad - used), dtype=f32)
    out_ref[...] = jnp.concatenate([w_, a_, z_, y_, mulv, pad], axis=-1)


# --------------------------- params (PyTorch-style init) --------------------

def _linear_params(key, fan_in, fan_out):
    """nn.Linear-style init, stored TRANSPOSED as [in, out] + [1, out] bias."""
    kw, kb = jax.random.split(key)
    bound = 1.0 / math.sqrt(fan_in)
    W = jax.random.uniform(kw, (fan_in, fan_out), jnp.float32, -bound, bound)
    b = jax.random.uniform(kb, (1, fan_out), jnp.float32, -bound, bound)
    return W, b


def init_vae_params(key, hidden_1, dim_y, dim_u, dim_a, dim_w, dim_z):
    in_features = dim_w + dim_a + dim_z + dim_y
    keys = jax.random.split(key, 8)
    p = {}
    p["fc1"] = _linear_params(keys[0], in_features, hidden_1)
    p["fc21"] = _linear_params(keys[1], hidden_1, dim_u)
    p["fc22"] = _linear_params(keys[2], hidden_1, dim_u)
    p["fc_z"] = _linear_params(keys[3], dim_u, dim_z)
    p["fc_w"] = _linear_params(keys[4], dim_u, dim_w)
    p["fc_a"] = _linear_params(keys[5], dim_u + dim_z, dim_a)
    p["fc_y1"] = _linear_params(keys[6], dim_u + dim_a + dim_w, dim_y)
    p["fc_y2"] = _linear_params(keys[7], dim_y, dim_y)
    return p


# --------------------------- wrapper ----------------------------------------

def _round_up(x, m):
    return ((x + m - 1) // m) * m


def _choose_tile(B, tile_b_max):
    """Batch tile: multiple of 8, capped at tile_b_max, split so the grid has >=2 steps
    (both v7x TensorCores) whenever the batch allows two tiles."""
    B8 = _round_up(max(B, 1), 8)
    tb = min(_round_up(tile_b_max, 8), B8)
    if B8 > 8 and B8 <= tb:
        tb = max(_round_up((B8 + 1) // 2, 8), 8)
    return tb


def vae_forward(params, C_init, rng_key, w, a, z, y, *, tile_b=512):
    """Returns (wazy, mu, logvar) exactly like VAE.forward."""
    B = w.shape[0]
    dim_w, dim_a, dim_z, dim_y = w.shape[1], a.shape[1], z.shape[1], y.shape[1]
    dim_u = params["fc21"][0].shape[1]
    in_features = dim_w + dim_a + dim_z + dim_y
    dec_out = dim_w + dim_a + dim_z + dim_y
    bf16 = jnp.bfloat16

    W1, b1 = params["fc1"]
    W21, b21 = params["fc21"]
    W22, b22 = params["fc22"]
    Wz, bz = params["fc_z"]
    Ww, bw = params["fc_w"]
    Wa, ba = params["fc_a"]
    Wy1, by1 = params["fc_y1"]
    Wy2, by2 = params["fc_y2"]

    # glue: fuse fc21/fc22; fuse every u-consuming decode weight; split fc_a / fc_y1
    W2122 = jnp.concatenate([W21, W22], axis=1)
    b2122 = jnp.concatenate([b21, b22], axis=1)

    Wau, Waz = Wa[:dim_u], Wa[dim_u:]
    Wy1u = Wy1[:dim_u]
    Wy1a = Wy1[dim_u:dim_u + dim_a]
    Wy1w = Wy1[dim_u + dim_a:]
    Wdec = jnp.concatenate([Wz, Ww, Wau, Wy1u], axis=1)     # [dim_u, dim_z+dim_w+dim_a+dim_y]
    bdec = jnp.concatenate([bz, bw, ba, by1], axis=1)

    # glue: randomness generated with jax.random (distributionally == torch randn/bernoulli)
    # TODO(synk): RNG streams are not bit-identical to PyTorch's, only distributionally equal.
    k_eps, k_unif = jax.random.split(rng_key)
    eps = jax.random.normal(k_eps, (B, dim_u), jnp.float32)
    unif = jax.random.uniform(k_unif, (B, dim_a), jnp.float32)

    # tiling: large adaptive batch tile, padded to a multiple of the tile
    tb = _choose_tile(B, tile_b)
    Bp = _round_up(max(B, 1), tb)
    grid = (Bp // tb,)

    # glue: ONE lane-dense f32 input slab [x | eps | unif | 0-pad] padded to 128 lanes
    in_used = in_features + dim_u + dim_a
    in_pad = _round_up(in_used, 128)
    slab = jnp.concatenate(
        [w.astype(jnp.float32), a.astype(jnp.float32),
         z.astype(jnp.float32), y.astype(jnp.float32), eps, unif], axis=-1)
    slab = jnp.pad(slab, ((0, Bp - B), (0, in_pad - in_used)))

    out_used = dec_out + 2 * dim_u
    out_pad = _round_up(out_used, 128)

    # weight/bias inputs: resident block (index_map -> block 0 every grid step)
    weights = (
        W1.astype(bf16), b1,
        W2122.astype(bf16), b2122,
        Wdec.astype(bf16), bdec,
        Waz.astype(bf16),
        Wy1a.astype(bf16), Wy1w.astype(bf16),
        Wy2.astype(bf16), by2,
    )

    def resident(arr):
        return pl.BlockSpec(arr.shape, lambda i: (0, 0))

    in_specs = [pl.BlockSpec((tb, in_pad), lambda i: (i, 0))] \
        + [resident(wgt) for wgt in weights]
    out_specs = pl.BlockSpec((tb, out_pad), lambda i: (i, 0))
    out_shape = jax.ShapeDtypeStruct((Bp, out_pad), jnp.float32)

    # glue: C baked as a static constant (forward-pass semantics unchanged).
    kernel = functools.partial(
        _vae_kernel,
        C=float(C_init),
        dim_u=dim_u, dim_z=dim_z, dim_w=dim_w, dim_a=dim_a, dim_y=dim_y,
        in_features=in_features, out_pad=out_pad,
    )

    out_p = pl.pallas_call(
        kernel,
        grid=grid,
        in_specs=in_specs,
        out_specs=out_specs,
        out_shape=out_shape,
        compiler_params=pltpu.CompilerParams(
            dimension_semantics=("parallel",),
            vmem_limit_bytes=32 * 1024 * 1024,
        ),
    )(slab, *weights)

    out = out_p[:B]
    wazy = out[:, :dec_out]
    mu = out[:, dec_out:dec_out + dim_u]
    logvar = out[:, dec_out + dim_u:dec_out + 2 * dim_u]
    return wazy, mu, logvar


# --------------------------------- main -------------------------------------

if __name__ == "__main__":
    batch = 16          # small demo batch; wrapper splits it into 2 grid steps
    hidden_1 = 32
    dim_y, dim_u, dim_a, dim_w, dim_z = 3, 16, 4, 6, 5
    C_init = 0.5

    key = jax.random.PRNGKey(0)
    kp, kr, kw, ka, kz, ky = jax.random.split(key, 6)

    params = init_vae_params(kp, hidden_1, dim_y, dim_u, dim_a, dim_w, dim_z)

    w_in = jax.random.normal(kw, (batch, dim_w), jnp.float32)
    a_in = (jax.random.uniform(ka, (batch, dim_a)) < 0.5).astype(jnp.float32)
    z_in = jax.random.normal(kz, (batch, dim_z), jnp.float32)
    y_in = jax.random.normal(ky, (batch, dim_y), jnp.float32)

    wazy, mu, logvar = vae_forward(params, C_init, kr, w_in, a_in, z_in, y_in)
    jax.block_until_ready((wazy, mu, logvar))

    assert wazy.shape == (batch, dim_w + dim_a + dim_z + dim_y)
    assert mu.shape == (batch, dim_u) and logvar.shape == (batch, dim_u)
    assert bool(jnp.all(jnp.isfinite(wazy)))
    assert bool(jnp.all(jnp.isfinite(mu))) and bool(jnp.all(jnp.isfinite(logvar)))
    # the a_ block of wazy must be exactly 0/1 (Bernoulli sample)
    a_block = wazy[:, dim_w:dim_w + dim_a]
    assert bool(jnp.all((a_block == 0.0) | (a_block == 1.0)))
    print("KERNEL_OK")
</pallas_src>

<mosaic_0001>
module attributes {stable_mosaic.version = 11 : i64} {
  func.func @_vae_kernel(%arg0: i32, %arg1: memref<8x128xf32, #tpu.memory_space<vmem>>, %arg2: memref<18x32xbf16, #tpu.memory_space<vmem>>, %arg3: memref<1x32xf32, #tpu.memory_space<vmem>>, %arg4: memref<32x32xbf16, #tpu.memory_space<vmem>>, %arg5: memref<1x32xf32, #tpu.memory_space<vmem>>, %arg6: memref<16x18xbf16, #tpu.memory_space<vmem>>, %arg7: memref<1x18xf32, #tpu.memory_space<vmem>>, %arg8: memref<5x4xbf16, #tpu.memory_space<vmem>>, %arg9: memref<4x3xbf16, #tpu.memory_space<vmem>>, %arg10: memref<6x3xbf16, #tpu.memory_space<vmem>>, %arg11: memref<3x3xbf16, #tpu.memory_space<vmem>>, %arg12: memref<1x3xf32, #tpu.memory_space<vmem>>, %arg13: memref<8x128xf32, #tpu.memory_space<vmem>>) attributes {dimension_semantics = [#tpu.dimension_semantics<parallel>], iteration_bounds = array<i64: 2>, scalar_prefetch = 0 : i64, scratch_operands = 0 : i64, tpu.core_type = #tpu.core_type<tc>, window_params = [{transform_indices = @transform_0, window_bounds = array<i64: 8, 128>}, {pipeline_mode = #tpu.pipeline_mode<synchronous>, transform_indices = @transform_1, window_bounds = array<i64: 18, 32>}, {pipeline_mode = #tpu.pipeline_mode<synchronous>, transform_indices = @transform_2, window_bounds = array<i64: 1, 32>}, {pipeline_mode = #tpu.pipeline_mode<synchronous>, transform_indices = @transform_3, window_bounds = array<i64: 32, 32>}, {pipeline_mode = #tpu.pipeline_mode<synchronous>, transform_indices = @transform_4, window_bounds = array<i64: 1, 32>}, {pipeline_mode = #tpu.pipeline_mode<synchronous>, transform_indices = @transform_5, window_bounds = array<i64: 16, 18>}, {pipeline_mode = #tpu.pipeline_mode<synchronous>, transform_indices = @transform_6, window_bounds = array<i64: 1, 18>}, {pipeline_mode = #tpu.pipeline_mode<synchronous>, transform_indices = @transform_7, window_bounds = array<i64: 5, 4>}, {pipeline_mode = #tpu.pipeline_mode<synchronous>, transform_indices = @transform_8, window_bounds = array<i64: 4, 3>}, {pipeline_mode = #tpu.pipeline_mode<synchronous>, transform_indices = @transform_9, window_bounds = array<i64: 6, 3>}, {pipeline_mode = #tpu.pipeline_mode<synchronous>, transform_indices = @transform_10, window_bounds = array<i64: 3, 3>}, {pipeline_mode = #tpu.pipeline_mode<synchronous>, transform_indices = @transform_11, window_bounds = array<i64: 1, 3>}, {transform_indices = @transform_12, window_bounds = array<i64: 8, 128>}]} {
    %c0 = arith.constant 0 : index
    %c0_0 = arith.constant 0 : index
    %0 = vector.load %arg1[%c0, %c0_0] : memref<8x128xf32, #tpu.memory_space<vmem>>, vector<8x128xf32>
    %1 = vector.extract_strided_slice %0 {offsets = [0, 0], sizes = [8, 18], strides = [1, 1]} : vector<8x128xf32> to vector<8x18xf32>
    %2 = arith.truncf %1 : vector<8x18xf32> to vector<8x18xbf16>
    %3 = vector.extract_strided_slice %0 {offsets = [0, 18], sizes = [8, 16], strides = [1, 1]} : vector<8x128xf32> to vector<8x16xf32>
    %4 = vector.extract_strided_slice %0 {offsets = [0, 34], sizes = [8, 4], strides = [1, 1]} : vector<8x128xf32> to vector<8x4xf32>
    %c0_1 = arith.constant 0 : index
    %c0_2 = arith.constant 0 : index
    %5 = vector.load %arg2[%c0_1, %c0_2] : memref<18x32xbf16, #tpu.memory_space<vmem>>, vector<18x32xbf16>
    %cst = arith.constant dense<0.000000e+00> : vector<8x32xf32>
    %6 = tpu.matmul %2, %5, %cst {dimension_numbers = #tpu.dot_dimension_numbers<[1], [0], [0], [1], [0, 0, 1, 1], [], []>} : vector<8x18xbf16>, vector<18x32xbf16>, vector<8x32xf32> -> vector<8x32xf32>
    %c0_3 = arith.constant 0 : index
    %c0_4 = arith.constant 0 : index
    %7 = vector.load %arg3[%c0_3, %c0_4] : memref<1x32xf32, #tpu.memory_space<vmem>>, vector<1x32xf32>
    %8 = vector.broadcast %7 : vector<1x32xf32> to vector<8x32xf32>
    %9 = arith.addf %6, %8 : vector<8x32xf32>
    %cst_5 = arith.constant 0.000000e+00 : f32
    %10 = vector.broadcast %cst_5 : f32 to vector<8x32xf32>
    %11 = arith.maximumf %9, %10 : vector<8x32xf32>
    %12 = arith.truncf %11 : vector<8x32xf32> to vector<8x32xbf16>
    %c0_6 = arith.constant 0 : index
    %c0_7 = arith.constant 0 : index
    %13 = vector.load %arg4[%c0_6, %c0_7] : memref<32x32xbf16, #tpu.memory_space<vmem>>, vector<32x32xbf16>
    %cst_8 = arith.constant dense<0.000000e+00> : vector<8x32xf32>
    %14 = tpu.matmul %12, %13, %cst_8 {dimension_numbers = #tpu.dot_dimension_numbers<[1], [0], [0], [1], [0, 0, 1, 1], [], []>} : vector<8x32xbf16>, vector<32x32xbf16>, vector<8x32xf32> -> vector<8x32xf32>
    %c0_9 = arith.constant 0 : index
    %c0_10 = arith.constant 0 : index
    %15 = vector.load %arg5[%c0_9, %c0_10] : memref<1x32xf32, #tpu.memory_space<vmem>>, vector<1x32xf32>
    %16 = vector.broadcast %15 : vector<1x32xf32> to vector<8x32xf32>
    %17 = arith.addf %14, %16 : vector<8x32xf32>
    %18 = vector.extract_strided_slice %17 {offsets = [0, 0], sizes = [8, 16], strides = [1, 1]} : vector<8x32xf32> to vector<8x16xf32>
    %19 = vector.extract_strided_slice %17 {offsets = [0, 16], sizes = [8, 16], strides = [1, 1]} : vector<8x32xf32> to vector<8x16xf32>
    %cst_11 = arith.constant 5.000000e-01 : f32
    %20 = vector.broadcast %cst_11 : f32 to vector<8x16xf32>
    %21 = arith.mulf %20, %19 : vector<8x16xf32>
    %22 = math.exp %21 : vector<8x16xf32>
    %23 = arith.mulf %3, %22 : vector<8x16xf32>
    %24 = arith.addf %18, %23 : vector<8x16xf32>
    %25 = arith.truncf %24 : vector<8x16xf32> to vector<8x16xbf16>
    %c0_12 = arith.constant 0 : index
    %c0_13 = arith.constant 0 : index
    %26 = vector.load %arg6[%c0_12, %c0_13] : memref<16x18xbf16, #tpu.memory_space<vmem>>, vector<16x18xbf16>
    %cst_14 = arith.constant dense<0.000000e+00> : vector<8x18xf32>
    %27 = tpu.matmul %25, %26, %cst_14 {dimension_numbers = #tpu.dot_dimension_numbers<[1], [0], [0], [1], [0, 0, 1, 1], [], []>} : vector<8x16xbf16>, vector<16x18xbf16>, vector<8x18xf32> -> vector<8x18xf32>
    %c0_15 = arith.constant 0 : index
    %c0_16 = arith.constant 0 : index
    %28 = vector.load %arg7[%c0_15, %c0_16] : memref<1x18xf32, #tpu.memory_space<vmem>>, vector<1x18xf32>
    %29 = vector.broadcast %28 : vector<1x18xf32> to vector<8x18xf32>
    %30 = arith.addf %27, %29 : vector<8x18xf32>
    %31 = vector.extract_strided_slice %30 {offsets = [0, 0], sizes = [8, 5], strides = [1, 1]} : vector<8x18xf32> to vector<8x5xf32>
    %32 = vector.extract_strided_slice %30 {offsets = [0, 5], sizes = [8, 6], strides = [1, 1]} : vector<8x18xf32> to vector<8x6xf32>
    %33 = vector.extract_strided_slice %30 {offsets = [0, 11], sizes = [8, 4], strides = [1, 1]} : vector<8x18xf32> to vector<8x4xf32>
    %34 = vector.extract_strided_slice %30 {offsets = [0, 15], sizes = [8, 3], strides = [1, 1]} : vector<8x18xf32> to vector<8x3xf32>
    %35 = arith.truncf %31 : vector<8x5xf32> to vector<8x5xbf16>
    %c0_17 = arith.constant 0 : index
    %c0_18 = arith.constant 0 : index
    %36 = vector.load %arg8[%c0_17, %c0_18] : memref<5x4xbf16, #tpu.memory_space<vmem>>, vector<5x4xbf16>
    %cst_19 = arith.constant dense<0.000000e+00> : vector<8x4xf32>
    %37 = tpu.matmul %35, %36, %cst_19 {dimension_numbers = #tpu.dot_dimension_numbers<[1], [0], [0], [1], [0, 0, 1, 1], [], []>} : vector<8x5xbf16>, vector<5x4xbf16>, vector<8x4xf32> -> vector<8x4xf32>
    %38 = arith.addf %33, %37 : vector<8x4xf32>
    %cst_20 = arith.constant 0.000000e+00 : f32
    %39 = vector.broadcast %cst_20 : f32 to vector<8x4xf32>
    %40 = arith.subf %39, %38 : vector<8x4xf32>
    %41 = math.exp %40 : vector<8x4xf32>
    %cst_21 = arith.constant 1.000000e+00 : f32
    %42 = vector.broadcast %cst_21 : f32 to vector<8x4xf32>
    %43 = arith.addf %42, %41 : vector<8x4xf32>
    %44 = tpu.reciprocal %43 {approx = true} : vector<8x4xf32> -> vector<8x4xf32>
    %45 = arith.cmpf olt, %4, %44 : vector<8x4xf32>
    %46 = arith.extui %45 : vector<8x4xi1> to vector<8x4xi32>
    %47 = arith.sitofp %46 : vector<8x4xi32> to vector<8x4xf32>
    %48 = arith.truncf %47 : vector<8x4xf32> to vector<8x4xbf16>
    %c0_22 = arith.constant 0 : index
    %c0_23 = arith.constant 0 : index
    %49 = vector.load %arg9[%c0_22, %c0_23] : memref<4x3xbf16, #tpu.memory_space<vmem>>, vector<4x3xbf16>
    %cst_24 = arith.constant dense<0.000000e+00> : vector<8x3xf32>
    %50 = tpu.matmul %48, %49, %cst_24 {dimension_numbers = #tpu.dot_dimension_numbers<[1], [0], [0], [1], [0, 0, 1, 1], [], []>} : vector<8x4xbf16>, vector<4x3xbf16>, vector<8x3xf32> -> vector<8x3xf32>
    %51 = arith.addf %34, %50 : vector<8x3xf32>
    %52 = arith.truncf %32 : vector<8x6xf32> to vector<8x6xbf16>
    %c0_25 = arith.constant 0 : index
    %c0_26 = arith.constant 0 : index
    %53 = vector.load %arg10[%c0_25, %c0_26] : memref<6x3xbf16, #tpu.memory_space<vmem>>, vector<6x3xbf16>
    %cst_27 = arith.constant dense<0.000000e+00> : vector<8x3xf32>
    %54 = tpu.matmul %52, %53, %cst_27 {dimension_numbers = #tpu.dot_dimension_numbers<[1], [0], [0], [1], [0, 0, 1, 1], [], []>} : vector<8x6xbf16>, vector<6x3xbf16>, vector<8x3xf32> -> vector<8x3xf32>
    %55 = arith.addf %51, %54 : vector<8x3xf32>
    %cst_28 = arith.constant 0.000000e+00 : f32
    %56 = vector.broadcast %cst_28 : f32 to vector<8x3xf32>
    %57 = arith.maximumf %55, %56 : vector<8x3xf32>
    %58 = arith.truncf %57 : vector<8x3xf32> to vector<8x3xbf16>
    %c0_29 = arith.constant 0 : index
    %c0_30 = arith.constant 0 : index
    %59 = vector.load %arg11[%c0_29, %c0_30] : memref<3x3xbf16, #tpu.memory_space<vmem>>, vector<3x3xbf16>
    %cst_31 = arith.constant dense<0.000000e+00> : vector<8x3xf32>
    %60 = tpu.matmul %58, %59, %cst_31 {dimension_numbers = #tpu.dot_dimension_numbers<[1], [0], [0], [1], [0, 0, 1, 1], [], []>} : vector<8x3xbf16>, vector<3x3xbf16>, vector<8x3xf32> -> vector<8x3xf32>
    %c0_32 = arith.constant 0 : index
    %c0_33 = arith.constant 0 : index
    %61 = vector.load %arg12[%c0_32, %c0_33] : memref<1x3xf32, #tpu.memory_space<vmem>>, vector<1x3xf32>
    %62 = vector.broadcast %61 : vector<1x3xf32> to vector<8x3xf32>
    %63 = arith.addf %60, %62 : vector<8x3xf32>
    %cst_34 = arith.constant 0.000000e+00 : f32
    %64 = vector.broadcast %cst_34 : f32 to vector<8x78xf32>
    %65 = tpu.concatenate %32, %47, %31, %63, %17, %64 in 1 : vector<8x6xf32>, vector<8x4xf32>, vector<8x5xf32>, vector<8x3xf32>, vector<8x32xf32>, vector<8x78xf32> -> vector<8x128xf32>
    %c0_35 = arith.constant 0 : index
    %c0_36 = arith.constant 0 : index
    %66 = vector.load %arg13[%c0_35, %c0_36] : memref<8x128xf32, #tpu.memory_space<vmem>>, vector<8x128xf32>
    tpu.vector_store %arg13[%c0_35, %c0_36], %65 {strides = array<i32>} : memref<8x128xf32, #tpu.memory_space<vmem>>, vector<8x128xf32>,
    return
  }
  func.func @transform_0(%arg0: i32) -> (i32, i32) {
    %c0_i32 = arith.constant 0 : i32
    %c0_i32_0 = arith.constant 0 : i32
    return %arg0, %c0_i32 : i32, i32
  }
  func.func @transform_1(%arg0: i32) -> (i32, i32) {
    %c0_i32 = arith.constant 0 : i32
    %c0_i32_0 = arith.constant 0 : i32
    %c0_i32_1 = arith.constant 0 : i32
    return %c0_i32, %c0_i32_0 : i32, i32
  }
  func.func @transform_2(%arg0: i32) -> (i32, i32) {
    %c0_i32 = arith.constant 0 : i32
    %c0_i32_0 = arith.constant 0 : i32
    %c0_i32_1 = arith.constant 0 : i32
    return %c0_i32, %c0_i32_0 : i32, i32
  }
  func.func @transform_3(%arg0: i32) -> (i32, i32) {
    %c0_i32 = arith.constant 0 : i32
    %c0_i32_0 = arith.constant 0 : i32
    %c0_i32_1 = arith.constant 0 : i32
    return %c0_i32, %c0_i32_0 : i32, i32
  }
  func.func @transform_4(%arg0: i32) -> (i32, i32) {
    %c0_i32 = arith.constant 0 : i32
    %c0_i32_0 = arith.constant 0 : i32
    %c0_i32_1 = arith.constant 0 : i32
    return %c0_i32, %c0_i32_0 : i32, i32
  }
  func.func @transform_5(%arg0: i32) -> (i32, i32) {
    %c0_i32 = arith.constant 0 : i32
    %c0_i32_0 = arith.constant 0 : i32
    %c0_i32_1 = arith.constant 0 : i32
    return %c0_i32, %c0_i32_0 : i32, i32
  }
  func.func @transform_6(%arg0: i32) -> (i32, i32) {
    %c0_i32 = arith.constant 0 : i32
    %c0_i32_0 = arith.constant 0 : i32
    %c0_i32_1 = arith.constant 0 : i32
    return %c0_i32, %c0_i32_0 : i32, i32
  }
  func.func @transform_7(%arg0: i32) -> (i32, i32) {
    %c0_i32 = arith.constant 0 : i32
    %c0_i32_0 = arith.constant 0 : i32
    %c0_i32_1 = arith.constant 0 : i32
    return %c0_i32, %c0_i32_0 : i32, i32
  }
  func.func @transform_8(%arg0: i32) -> (i32, i32) {
    %c0_i32 = arith.constant 0 : i32
    %c0_i32_0 = arith.constant 0 : i32
    %c0_i32_1 = arith.constant 0 : i32
    return %c0_i32, %c0_i32_0 : i32, i32
  }
  func.func @transform_9(%arg0: i32) -> (i32, i32) {
    %c0_i32 = arith.constant 0 : i32
    %c0_i32_0 = arith.constant 0 : i32
    %c0_i32_1 = arith.constant 0 : i32
    return %c0_i32, %c0_i32_0 : i32, i32
  }
  func.func @transform_10(%arg0: i32) -> (i32, i32) {
    %c0_i32 = arith.constant 0 : i32
    %c0_i32_0 = arith.constant 0 : i32
    %c0_i32_1 = arith.constant 0 : i32
    return %c0_i32, %c0_i32_0 : i32, i32
  }
  func.func @transform_11(%arg0: i32) -> (i32, i32) {
    %c0_i32 = arith.constant 0 : i32
    %c0_i32_0 = arith.constant 0 : i32
    %c0_i32_1 = arith.constant 0 : i32
    return %c0_i32, %c0_i32_0 : i32, i32
  }
  func.func @transform_12(%arg0: i32) -> (i32, i32) {
    %c0_i32 = arith.constant 0 : i32
    %c0_i32_0 = arith.constant 0 : i32
    return %arg0, %c0_i32 : i32, i32
  }
}

</mosaic_0001>

<bundles_post_ra>
// kernel: tpu_custom_call.1
= control target key start
LH: loop header
LB: loop body
LE: loop exit
PB: predicated region body
PF: predicated region fallthrough
CT: control target
= control target key end

     0   :  { %s1596_s0 = inlined_call_operand.hbm [shape: f32[16,128], index: 0, kind: input, shape index: {}]   ;;  %s1597_s1 = inlined_call_operand.hbm [shape: bf16[18,32], index: 1, kind: input, shape index: {}]   ;;  %s1598_s2 = inlined_call_operand.hbm [shape: f32[1,32], index: 2, kind: input, shape index: {}]   ;;  %s1599_s3 = inlined_call_operand.hbm [shape: bf16[32,32], index: 3, kind: input, shape index: {}]   ;;  %s1600_s4 = inlined_call_operand.hbm [shape: f32[1,32], index: 4, kind: input, shape index: {}]   ;;  %s1601_s5 = inlined_call_operand.vmem [shape: bf16[16,18], index: 5, kind: input, shape index: {}]   ;;  %s1602_s6 = inlined_call_operand.vmem [shape: f32[1,18], index: 6, kind: input, shape index: {}]   ;;  %s1603_s7 = inlined_call_operand.vmem [shape: bf16[5,4], index: 7, kind: input, shape index: {}]   ;;  %s1604_s8 = inlined_call_operand.vmem [shape: bf16[4,3], index: 8, kind: input, shape index: {}]   ;;  %s1605_s9 = inlined_call_operand.vmem [shape: bf16[6,3], index: 9, kind: input, shape index: {}]   ;;  %s1606_s10 = inlined_call_operand.vmem [shape: bf16[3,3], index: 10, kind: input, shape index: {}]   ;;  %s1607_s11 = inlined_call_operand.vmem [shape: f32[1,3], index: 11, kind: input, shape index: {}]   ;;  %s1608_s12 = inlined_call_operand.hbm [shape: f32[16,128], index: 12, kind: output, shape index: {}]  }
   0x1   :  { %1612 = sst [smem:[#allocation19_spill]] %s1597_s1 }
   0x2   :  { %1613 = sst [smem:[#allocation20_spill]] %s1598_s2 }
   0x3   :  { %1614 = sst [smem:[#allocation21_spill]] %s1599_s3 }
   0x4   :  { %1615 = sst [smem:[#allocation22_spill]] %s1600_s4 }
   0x5   :  { %17 = vsyncpa [#allocation3], 0 }
   0x6   :  { %19 = vsyncpa [#allocation3 + $0x1], 0 }
   0x7   :  { %20 = vsyncpa [#allocation6], 0 }
   0x8   :  { %21 = vsyncpa [#allocation9], 0 }
   0x9   :  { %22 = vsyncpa [#allocation4], 0 }
   0xa   :  { %24 = vsyncpa [#allocation4 + $0x1], 0  ;;  %s1371_s21 = smov 0   ;;  %s1373_s22 = smov 0  }
   0xb   :  { %s1375_s23 = smov 0   ;;  %s1377_s24 = smov 0  }
   0xc LB: > { %1616 = sst [smem:[#allocation16_spill]] %s1281_s23  ;;  %s1395_s28 = sadd.s32 4294967295, %s1285_s24   ;;  %s1285_s24 = sphi %s1377_s24, %s1631_s24   ;;  %s1281_s23 = sphi %s1375_s23, %s1633_s23   ;;  %s1277_s22 = sphi %s1373_s22, %s1635_s22   ;;  %s1273_s21 = sphi %s1371_s21, %s1634_s21  }
   0xd   : > { %s1617_s1 = sld [smem:[#allocation19_spill]]  ;;  %p902_p0 = scmp.ge.s32.totalorder %s1285_s24, 1 }
   0xe   : > { %p51_p1 = scmp.eq.s32.totalorder %s1395_s28, 0  ;;  %p318_p2 = scmp.lt.s32.totalorder %s1285_s24, 3 }
   0xf   : > { %s1287_s30 = smov [#allocation5]   ;;  %s1619_s3 = sld [smem:[#allocation21_spill]] }
  0x10   : > { %p1400_p3 = pnand %p902_p0, %p318_p2  ;;  %s331_s13 = sshll.u32 %s1287_s30, 4  ;;  %s332_s13 = int_to_ptr.vmem [resolvable:$true] %s331_s13 }
  0x11   : > { %s1621_s2 = sld [smem:[#allocation20_spill]]  ;;  %s1288_s25 = smov [#allocation8]  }
  0x12   : > { %p969_p4 = pneg %p1400_p3  ;;  %s357_s26 = sshll.u32 %s1288_s25, 4  ;;  %s358_s26 = int_to_ptr.vmem [resolvable:$true] %s357_s26 }
  0x13   : > { %s329_s27 = sshll.u32 %s1617_s1, 4  ;;  %s1289_s30 = smov 64   ;;  %s330_s27 = int_to_ptr.hbm [resolvable:$true] %s329_s27 }
  0x14   : > { %p1412_p6 = pnand %p969_p4, %p51_p1  ;;  %s1290_s14 = smov 4  }
  0x15   : > { %s355_s16 = sshll.u32 %s1619_s3, 4  ;;  %s1622_s4 = sld [smem:[#allocation22_spill]]  ;;  %s356_s16 = int_to_ptr.hbm [resolvable:$true] %s355_s16 }
  0x16   : > { %972 = dma.hbm_to_vmem [thread:$0]  (!%p1412_p6), %s330_s27, 192, %s332_s13, [#allocation6], %s1289_s30, %s1289_s30, %s1290_s14  }
  0x17   : > { %s344_s20 = sshll.u32 %s1621_s2, 4  ;;  %s1291_s19 = smov [#allocation7]   ;;  %s345_s20 = int_to_ptr.hbm [resolvable:$true] %s344_s20 }
  0x18   : > { %978 = dma.hbm_to_vmem [thread:$0]  (!%p1412_p6), %s356_s16, 256, %s358_s26, [#allocation9], %s1289_s30, %s1289_s30, %s1290_s14  }
  0x19   : > { %s346_s25 = sshll.u32 %s1291_s19, 4  ;;  %s1292_s27 = smov [#allocation10]   ;;  %s347_s25 = int_to_ptr.vmem [resolvable:$true] %s346_s25 }
  0x1a   : > { %975 = dma.hbm_to_vmem [thread:$0]  (!%p1412_p6), %s345_s20, 16, %s347_s25, [#allocation6]  }
  0x1b   : > { %s370_s18 = sshll.u32 %s1622_s4, 4  ;;  %s372_s13 = sshll.u32 %s1292_s27, 4  ;;  %s371_s18 = int_to_ptr.hbm [resolvable:$true] %s370_s18  ;;  %s373_s13 = int_to_ptr.vmem [resolvable:$true] %s372_s13 }
  0x1c   : > { %981 = dma.hbm_to_vmem [thread:$0]  (!%p1412_p6), %s371_s18, 16, %s373_s13, [#allocation9]  }
  0x1d   : > { %s901_s1 = sadd.s32 4294967294, %s1285_s24   ;;  %s1432_s16 = sadd.s32 1, %s1285_s24  }
  0x1e   : > { %1623 = sst [smem:[#allocation17_spill]] %s1432_s16  ;;  %s34_s26 = ssub.s32 %s1285_s24, %s1432_s16 }
  0x1f   : > { %s37_s30 = sadd.s32 1, %s1281_s23  ;;  %p35_p7 = scmp.eq.s32.totalorder %s34_s26, 0 }
  0x20   : > { %p44_p8 = scmp.ne.s32.totalorder %s1281_s23, %s1277_s22  ;;  %p45_p9 = scmp.eq.s32.totalorder %s1285_s24, 0 }
  0x21   : > { %p50_p10 = scmp.ne.s32.totalorder %s1277_s22, %s1273_s21  ;;  %p305_p13 = scmp.eq.s32.totalorder %s1395_s28, 1 }
  0x22   : > { %s1443_s20 = scalar_select %p35_p7, %s1281_s23, %s37_s30  }
  0x23   : > { %p1445_p11 = por %p45_p9, %p44_p8  ;;  %p1451_p12 = por %p51_p1, %p50_p10 }
  0x24   : > { %1624 = sst [smem:[#allocation18_spill]] %s1443_s20  ;;  %p311_p0 = scmp.eq.s32.totalorder %s901_s1, 1 }
  0x25   : > { %p994_p2 = scmp.lt.s32.totalorder %s1285_s24, 2  ;;  %s404_s15 = sand.u32 1, %s1281_s23  }
  0x26   : > { %p1458_p4 = por %p305_p13, %p44_p8  ;;  %p1462_p6 = por %p311_p0, %p50_p10 }
  0x27   : > { %s908_s25 = sshll.u32 %s404_s15, 3  ;;  %s909_s27 = sshll.u32 %s1285_s24, 3 }
  0x28   : > { %s412_s30 = scalar_lea.hbm %s1596_s0, %s909_s27  ;;  %s408_s2 = scalar_lea.vmem [#allocation2], %s908_s25 }
  0x29   : > { %s416_s3 = sshll.u32 %s408_s2, 4  ;;  %s414_s4 = sshll.u32 %s412_s30, 4  ;;  %s417_s3 = int_to_ptr.vmem [resolvable:$true] %s416_s3  ;;  %s415_s4 = int_to_ptr.hbm [resolvable:$true] %s414_s4 }
  0x2a   : > { %p1472_p7 = pnand %p994_p2, %p1445_p11  ;;  %s405_s20 = scalar_lea.sflag [#allocation3], %s404_s15 }
  0x2b   : > { %s1181_s23 = sshra.s32 %s415_s4, 4  ;;  %s1188_s27 = scalar_lea.hbm %s1596_s0, 16  ;;  %s1182_s23 = int_to_ptr.hbm [resolvable:$true] %s1181_s23 }
  0x2c   : > { %s1183_s16 = scalar_lea.hbm %s1182_s23, 8  ;;  %p1185_p9 = pneg %p1472_p7 }
  0x2d   : > { %p1184_p8 = scmp.ne.s32.totalorder %s1182_s23, %s1183_s16  ;;  %p1189_p11 = scmp.lt.s32.totalorder %s1182_s23, %s1596_s0 }
  0x2e   : > { %p1190_p0 = scmp.lt.s32.totalorder %s1188_s27, %s1183_s16 }
  0x2f   : > { %p1186_p10 = pnand %p1185_p9, %p1184_p8 }
  0x30   : > { %p1191_p2 = por %p1190_p0, %p1189_p11 }
  0x31   : > { %p1187_p13 = pneg %p1186_p10 }
  0x33   : > { %p1192_p5 = pnand %p1191_p2, %p1187_p13 }
  0x35   : > { %1195 = shalt.err (!%p1192_p5)
}
  0x36   : > { %985 = dma.hbm_to_vmem [thread:$0]  (!%p1472_p7), %s415_s4, 128, %s417_s3, %s405_s20  }
  0x37   : > { %425 = sbr.rel (%p1400_p3) target bundleno = 1801 (0x709), region = 68  ;;  %s1489_s15 = sand.u32 (!%p1400_p3), 1, %s1277_s22  }
  0x38   : > { %s911_s26 = sshll.u32 (!%p1400_p3), %s1489_s15, 3  ;;  %s428_s30 = scalar_lea.sflag (!%p1400_p3), [#allocation3], %s1489_s15 }
  0x39   : > { %s431_s23 = scalar_lea.vmem (!%p1400_p3), [#allocation2], %s911_s26 }
  0x3c   : > { %1256 = dma.done.wait (%p1451_p12), %s428_s30, 128  }
  0x3d   : > { %1258 = vsyncadd (%p1451_p12), %s428_s30, 4294967168 }
  0x3e   : > { %1260 = dma.done.wait (%p51_p1), [#allocation6], 208  }
  0x3f   : > { %1262 = vsyncadd (%p51_p1), [#allocation6], 4294967088 }
  0x40   : > { %1264 = dma.done.wait (%p51_p1), [#allocation9], 272  }
  0x41   : > { %1266 = vsyncadd (%p51_p1), [#allocation9], 4294967024  ;;  %v498_v0 = vld [vmem:[#allocation5 + $0x8] sm:$0x1]  ;;  %vm516_vm0 = vcmask 1040384   ;;  %v945_v4 = vld [vmem:[#allocation5] sm:$0xff] }
  0x42   : > { %v508_v1 = vunpack.c.l.b16 %v498_v0  ;;  %v1508_v5 = vld [vmem:[%s431_s23] sm:$0xff]  ;;  %vm512_vm1 = vcmask 146432   ;;  %v1051_v9 = vld [vmem:[#allocation7] ss:$0 sm:$0xff]  ;;  %vm555_vm2 = vcmask 261120   ;;  %s1293_s3 = smov 2  }
  0x43   : > { %v495_v6 = vpack.c.bf16 %v1508_v5, %v1508_v5  ;;  %v947_v7 = vld [vmem:[#allocation8 + $0x8] sm:$0xff]  ;;  %v946_v8 = vld [vmem:[#allocation8] sm:$0xff]  ;;  %v1052_v15 = vld [vmem:[#allocation10] ss:$0 sm:$0xff]  ;;  %s1294_s4 = smov 110   ;;  %vm598_vm3 = vcmask 130048  }
  0x44   : > { %v510_v2 = vpack.c.b16 %v508_v1, %v508_v1  ;;  %565 = vmatpush.bf16.msra.mxu1 %v947_v7  ;;  %v948_v24 = vld [vmem:[%s1601_s5] sm:$0xff]  ;;  %vm621_vm4 = vcmask 1041408   ;;  %vm622_vm5 = vcmask 1042432   ;;  %v1295_v28 = vmov 65535   ;;  %s1296_s2 = smov 11   ;;  %s1297_s27 = smov 23  }
  0x45   : > { %609 = vmatpush.bf16.msra.mxu2 %v948_v24  ;;  %v623_v29 = vsel %vm621_vm4, 4294967295, %v1295_v28  ;;  %v616_v30 = vld [vmem:[%s1603_s7] sm:$0x7]  ;;  %vm617_vm6 = vcmask 39936   ;;  %v1298_v52 = vmov 0.0   ;;  %vm663_vm8 = vcmask 31744  }
  0x46   : > { %v518_v3 = vsel %vm516_vm0, %v510_v2, 0  ;;  %v624_v31 = vsel %vm622_vm5, %v623_v29, 0  ;;  %v1053_v33 = vld [vmem:[%s1602_s6] ss:$0 sm:$0xff]  ;;  %vm692_vm9 = vcmask 48128   ;;  %s1301_s29 = smov 15  }
  0x47   : > { %526 = vmatpush.bf16.msra.mxu0 %v518_v3  ;;  %v626_v32 = vand.u32 %v624_v31, %v616_v30  ;;  %v659_v47 = vld [vmem:[%s1604_s8] sm:$0x3]  ;;  %s1302_s16 = smov 100   ;;  %s1303_s20 = smov 18   ;;  %v731_v61 = vsel %vm516_vm0, 4294967295, %v1295_v28  ;;  %vm727_vm10 = vcmask 23552  }
  0x48   : > { %566 = vmatpush.bf16.msra.mxu1 %v946_v8  ;;  %v688_v48 = vld [vmem:[%s1605_s9] sm:$0x7]  ;;  %v668_v49 = vsel %vm621_vm4, %v659_v47, 0  ;;  %v732_v63 = vsel %vm621_vm4, %v731_v61, 0  ;;  %s1304_s25 = smov 113   ;;  %s942_s14 = sshll.u32 %s1395_s28, 3 }
  0x49   : > { %635 = vmatpush.bf16.msra.mxu3 %v626_v32  ;;  %v697_v50 = vsel %vm622_vm5, %v688_v48, 0  ;;  %677 = vmatpush.bf16.msrb.mxu2 %v668_v49  ;;  %v719_v62 = vld [vmem:[%s1606_s10] sm:$0x3]  ;;  %vm769_vm11 = vcmask 80896   ;;  %vm771_vm12 = vcmask 121856   ;;  %vm774_vm13 = vcmask 408576  }
  0x4a   : > { %v734_v0 = vand.u32 %v732_v63, %v719_v62  ;;  %v1054_v8 = vld [vmem:[%s1607_s11] ss:$0 sm:$0xff]  ;;  %s778_s28 = scalar_lea.sflag [#allocation4], %s1489_s15 }
  0x4b   : > { %527 = vmatpush.bf16.msra.mxu0 %v945_v4 }
  0x4d   : > { %706 = vmatpush.bf16.msrb.mxu3 %v697_v50 }
  0x4e   : > { %921 = vmatmul.msk.bf16.vlgmr.msra.gmra.mxu0 %vm512_vm1, %v495_v6 }
  0x4f   : > { %743 = vmatpush.bf16.msrb.mxu0 %v734_v0 }
  0xcb   : > { %v529_v10 = vpop.f32.mrf.mxu0 }
  0xcc   : > { %v530_v11 = vadd.f32 %v1051_v9, %v529_v10 }
  0xce   : > { %v533_v12 = vmax.f32 %v530_v11, 0.0 }
  0xd0   : > { %v534_v13 = vpack.c.bf16 %v533_v12, %v533_v12 }
  0xd2   : > { %930 = vmatmul.msk.bf16.vlgmr.msra.gmra.mxu1 %vm555_vm2, %v534_v13 }
  0xd3   : > { %v531_v14 = vpop.f32.mrf.mxu0 }
 0x14f   : > { %v568_v16 = vpop.f32.mrf.mxu1 }
 0x150   : > { %v1513_v17 = vadd.f32 %v1052_v15, %v568_v16 }
 0x152   : > { %v572_v18 = vmul.f32 0.5, %v1513_v17 }
 0x154   : > { %v573_v19 = vmul.f32 1.442695, %v572_v18 }
 0x156   : > { %1055 = vpow2.f32 %v573_v19 }
 0x157   : > { %v570_v20 = vpop.f32.mrf.mxu1 }
 0x15c   : > { %v1056_v21 = vpop.eup %1055 }
 0x15d   : > { %576 = vrot.lane.b32.xlu0 %v1056_v21, %s1293_s3  ;;  %s1299_s3 = smov 94  }
 0x1cf   : > { %v577_v22 = vpop.permute.xlu0 %576 }
 0x1d0   : > { %v579_v23 = vmul.f32 %v577_v22, %v1508_v5 }
 0x1d2   : > { %581 = vrot.lane.b32.xlu0 %v579_v23, %s1294_s4  ;;  %s1300_s4 = smov 123  }
 0x244   : > { %v582_v25 = vpop.permute.xlu0 %581 }
 0x245   : > { %v584_v26 = vadd.f32 %v582_v25, %v1513_v17 }
 0x247   : > { %v585_v27 = vpack.c.bf16 %v584_v26, %v584_v26 }
 0x249   : > { %935 = vmatmul.msk.bf16.vlgmr.msra.gmra.mxu2 %vm598_vm3, %v585_v27 }
 0x2cc   : > { %v611_v34 = vpop.f32.mrf.mxu2 }
 0x2cd   : > { %v1529_v35 = vadd.f32 %v1053_v33, %v611_v34 }
 0x2cf   : > { %v615_v36 = vpack.c.bf16 %v1529_v35, %v1529_v35 }
 0x2d1   : > { %936 = vmatmul.msk.bf16.vlgmr.msra.gmra.mxu3 %vm617_vm6, %v615_v36 }
 0x2d4   : > { %v613_v37 = vpop.f32.mrf.mxu2 }
 0x354   : > { %v637_v38 = vpop.f32.mrf.mxu3 }
 0x355   : > { %642 = vrot.lane.b32.xlu1 %v637_v38, %s1296_s2  ;;  %s1305_s2 = smov 10  }
 0x35c   : > { %v639_v39 = vpop.f32.mrf.mxu3 }
 0x3c7   : > { %v643_v40 = vpop.permute.xlu1 %642 }
 0x3c8   : > { %v645_v41 = vadd.f32 %v643_v40, %v1529_v35 }
 0x3ca   : > { %v646_v42 = vsub.f32 0.0, %v645_v41 }
 0x3cc   : > { %v647_v43 = vmul.f32 1.442695, %v646_v42 }
 0x3ce   : > { %1057 = vpow2.f32 %v647_v43 }
 0x3d4   : > { %v1058_v44 = vpop.eup %1057 }
 0x3d5   : > { %v649_v45 = vadd.f32 1.0, %v1058_v44 }
 0x3d7   : > { %1059 = vrcp.f32 %v649_v45 }
 0x3dd   : > { %v1060_v46 = vpop.eup %1059 }
 0x3de   : > { %652 = vrot.lane.b32.xlu1 %v1060_v46, %s1297_s27 }
 0x450   : > { %v653_v51 = vpop.permute.xlu1 %652 }
 0x451   : > { %vm655_vm7 = vcmp.lt.f32.partialorder %v1508_v5, %v653_v51 }
 0x452   : > { %v937_v53 = vsel %vm655_vm7, 1.0, %v1298_v52 }
 0x453   : > { %v658_v54 = vpack.c.bf16 %v937_v53, %v937_v53 }
 0x455   : > { %661 = vrot.lane.b32.xlu2 %v658_v54, %s1299_s3  ;;  %s788_s3 = scalar_lea.hbm %s1608_s12, %s942_s14 }
 0x45d   : > { %690 = vrot.lane.b32.xlu2 %v615_v36, %s1300_s4 }
 0x4af   : > { %v662_v55 = vpop.permute.xlu2 %661 }
 0x4b0   : > { %938 = vmatmul.msk.bf16.vlgmr.msrb.gmra.mxu2 %vm663_vm8, %v662_v55 }
 0x4b7   : > { %v691_v56 = vpop.permute.xlu2 %690 }
 0x4b8   : > { %939 = vmatmul.msk.bf16.vlgmr.msrb.gmra.mxu3 %vm692_vm9, %v691_v56 }
 0x533   : > { %v679_v57 = vpop.f32.mrf.mxu2 }
 0x534   : > { %684 = vrot.lane.b32.xlu0 %v679_v57, %s1301_s29 }
 0x53b   : > { %v681_v58 = vpop.f32.mrf.mxu2  ;;  %v708_v59 = vpop.f32.mrf.mxu3 }
 0x53c   : > { %750 = vrot.lane.b32.xlu0 %v1529_v35, %s1300_s4  ;;  %713 = vrot.lane.b32.xlu1 %v708_v59, %s1301_s29  ;;  %s492_s4 = scalar_lea.vmem [#allocation11], %s911_s26 }
 0x543   : > { %v710_v60 = vpop.f32.mrf.mxu3 }
 0x544   : > { %754 = vrot.lane.b32.xlu1 %v937_v53, %s1302_s16  ;;  %s790_s16 = sshll.u32 %s492_s4, 4  ;;  %s791_s16 = int_to_ptr.vmem [resolvable:$true] %s790_s16 }
 0x54c   : > { %765 = vrot.lane.b32.xlu1 %v1513_v17, %s1303_s20  ;;  %s792_s20 = sshll.u32 %s788_s3, 4  ;;  %s793_s20 = int_to_ptr.hbm [resolvable:$true] %s792_s20 }
 0x5a6   : > { %v685_v1 = vpop.permute.xlu0 %684 }
 0x5a7   : > { %v687_v2 = vadd.f32 %v685_v1, %v1529_v35 }
 0x5ae   : > { %v714_v3 = vpop.permute.xlu1 %713  ;;  %v751_v13 = vpop.permute.xlu0 %750 }
 0x5af   : > { %v716_v4 = vadd.f32 %v714_v3, %v687_v2 }
 0x5b1   : > { %v717_v5 = vmax.f32 %v716_v4, 0.0 }
 0x5b3   : > { %v718_v6 = vpack.c.bf16 %v717_v5, %v717_v5 }
 0x5b5   : > { %725 = vrot.lane.b32.xlu2 %v718_v6, %s1304_s25  ;;  %s1231_s25 = scalar_lea.hbm %s1608_s12, 16 }
 0x5b6   : > { %v755_v12 = vpop.permute.xlu1 %754 }
 0x5b7   : > { %v768_v15 = vsel %vm692_vm9, %v751_v13, %v755_v12 }
 0x5bd   : > { %757 = vrot.lane.b32.xlu2 %v1529_v35, %s1305_s2 }
 0x5be   : > { %v766_v18 = vpop.permute.xlu1 %765 }
 0x60f   : > { %v726_v7 = vpop.permute.xlu2 %725 }
 0x610   : > { %940 = vmatmul.msk.bf16.vlgmr.msrb.gmra.mxu0 %vm727_vm10, %v726_v7 }
 0x617   : > { %v758_v14 = vpop.permute.xlu2 %757 }
 0x618   : > { %v770_v16 = vsel %vm769_vm11, %v768_v15, %v758_v14 }
 0x68d   : > { %v745_v9 = vpop.f32.mrf.mxu0 }
 0x68e   : > { %v746_v10 = vadd.f32 %v1054_v8, %v745_v9 }
 0x690   : > { %761 = vrot.lane.b32.xlu0 %v746_v10, %s1301_s29  ;;  %s1225_s29 = sshra.s32 %s793_s20, 4  ;;  %s1226_s29 = int_to_ptr.hbm [resolvable:$true] %s1225_s29 }
 0x691   : > { %s1227_s17 = scalar_lea.hbm %s1226_s29, 8  ;;  %p1232_p12 = scmp.lt.s32.totalorder %s1226_s29, %s1608_s12 }
 0x692   : > { %p1228_p1 = scmp.ne.s32.totalorder %s1226_s29, %s1227_s17  ;;  %p1233_p7 = scmp.lt.s32.totalorder %s1231_s25, %s1227_s17 }
 0x694   : > { %p1229_p3 = pnand %p1228_p1, %p1458_p4  ;;  %p1234_p8 = por %p1233_p7, %p1232_p12 }
 0x695   : > { %v747_v11 = vpop.f32.mrf.mxu0 }
 0x696   : > { %p1230_p5 = pneg %p1229_p3 }
 0x698   : > { %p1235_p9 = pnand %p1234_p8, %p1230_p5 }
 0x702   : > { %v762_v17 = vpop.permute.xlu0 %761 }
 0x703   : > { %v772_v19 = vsel %vm771_vm12, %v770_v16, %v762_v17 }
 0x704   : > { %v773_v20 = vsel %vm512_vm1, %v772_v19, %v766_v18 }
 0x705   : > { %v775_v21 = vsel %vm774_vm13, %v773_v20, 0.0 }
 0x706   : > { %776 = vst [vmem:[%s492_s4] sm:$0xff] %v775_v21 }
 0x707   : > { %1238 = shalt.err (!%p1235_p9)
}
 0x708   : > { %967 = dma.vmem_to_hbm [thread:$0]  (%p1458_p4), %s791_s16, 128, %s793_s20, %s778_s28  }
 0x709 PF: > { %s804_s15 = sand.u32 1, %s1273_s21   ;;  %p1630_p10 = scmp.ge.s32.totalorder %s1285_s24, 2 }
 0x70a   : > { %s805_s13 = scalar_lea.sflag [#allocation4], %s804_s15 }
 0x70b   : > { %p987_p13 = pnand %p1630_p10, %p1462_p6 }
 0x70d   : > { %p988_p11 = pneg %p987_p13 }
 0x70f   : > { %1268 = dma.done.wait (%p988_p11), %s805_s13, 128  }
 0x710   : > { %1270 = vsyncadd (%p988_p11), %s805_s13, 4294967168  ;;  %s1631_s24 = sld [smem:[#allocation17_spill]]  ;;  %s1634_s21 = smov %s1277_s22 }
 0x711   : > { %s1632_s14 = sld [smem:[#allocation16_spill]] }
 0x712   : > { %s1633_s23 = sld [smem:[#allocation18_spill]] }
 0x716   : > { %p27_p0 = scmp.ge.s32.totalorder %s1631_s24, 4  }
 0x717   : > { %s1635_s22 = smov %s1632_s14 }
 0x718   :  { %29 = sbr.rel (!%p27_p0) target bundleno = 12 (0xc), region = 129 }
 0x71d   :  { %811 = vsyncpa [#allocation3], 1 }
 0x71e   :  { %813 = vsyncpa [#allocation3 + $0x1], 1 }
 0x71f   :  { %814 = vsyncpa [#allocation6], 1 }
 0x720   :  { %815 = vsyncpa [#allocation9], 1 }
 0x721   :  { %816 = vsyncpa [#allocation4], 1 }
 0x722   :  { %818 = vsyncpa [#allocation4 + $0x1], 1 }

</bundles_post_ra>
